<compile_context>
chip_gen: v7x
topology: tpu7x:2x2x1
jax: 0.10.0
libtpu: 0.0.40
codegen_flags: <defaults>
</compile_context>

<pallas_src>
import functools

import jax
import jax.numpy as jnp
from jax.experimental import pallas as pl
from jax.experimental.pallas import tpu as pltpu

_LANE = 128
_SUBLANE = 8
# Per-block budget: keeps double-buffered in+out plus in-kernel f32 temps well
# under the 16 MiB v5e default scoped-VMEM limit (and far under v7x's 64 MiB).
_BLOCK_BUDGET_BYTES = 2 * 1024 * 1024


def _pixelwise_norm_kernel(x_ref, o_ref, *, alpha, inv_c):
    # x_ref / o_ref: (1, C, rows_tile, 128) on the lane-dense path,
    #                (1, C, HW)            on the fallback path.
    # Channel axis (axis=1) is a leading dim -> reduction is cross-vreg VPU adds.
    x = x_ref[...].astype(jnp.float32)  # no-op for f32 inputs
    sum_sq = jnp.sum(x * x, axis=1, keepdims=True)
    # rsqrt runs on the EUP (its own VLIW slot) and only touches the reduced
    # tensor; folding 1/C in leaves a single full-tile VPU multiply.
    scale = jax.lax.rsqrt(sum_sq * inv_c + alpha)
    o_ref[...] = (x * scale).astype(o_ref.dtype)


def _choose_rows_tile(rows, c, itemsize):
    """Largest legal row tile: a multiple of 8 that divides `rows` (or the full
    extent) whose (1, C, rows_tile, 128) block stays inside the VMEM budget."""
    if rows <= _SUBLANE or rows % _SUBLANE != 0:
        return rows  # full extent is always a legal block dim
    candidates = [d for d in range(_SUBLANE, rows + 1, _SUBLANE) if rows % d == 0]
    if not candidates:
        return rows
    # max(itemsize, 4) accounts for the in-kernel f32 upcast of the tile.
    fitting = [d for d in candidates
               if c * d * _LANE * max(itemsize, 4) <= _BLOCK_BUDGET_BYTES]
    return max(fitting) if fitting else min(candidates)


def pixelwise_norm(x, alpha=1e-8):
    """x: (N, C, H, W). Returns x / sqrt(mean(x**2, dim=1, keepdim=True) + alpha)."""
    N, C, H, W = x.shape
    HW = H * W
    inv_c = 1.0 / C
    kernel = functools.partial(_pixelwise_norm_kernel, alpha=alpha, inv_c=inv_c)

    if HW % _LANE == 0:
        # Lane-dense path: spatial -> (rows, 128); tile rows; grid over (N, tiles).
        rows = HW // _LANE
        xr = x.reshape(N, C, rows, _LANE)
        rows_tile = _choose_rows_tile(rows, C, x.dtype.itemsize)
        grid = (N, rows // rows_tile)
        spec = pl.BlockSpec((1, C, rows_tile, _LANE), lambda n, s: (n, 0, s, 0))
        out = pl.pallas_call(
            kernel,
            out_shape=jax.ShapeDtypeStruct(xr.shape, x.dtype),
            grid_spec=pltpu.PrefetchScalarGridSpec(
                num_scalar_prefetch=0,
                grid=grid,
                in_specs=[spec],
                out_specs=spec,
            ),
            compiler_params=pltpu.CompilerParams(
                dimension_semantics=("parallel", "parallel"),
            ),
        )(xr)
        return out.reshape(N, C, H, W)

    # Fallback for H*W not a multiple of 128: flatten spatial fully (lane axis is
    # as dense as the shape allows), one batch element per grid step.
    # TODO(synk): pad H*W up to a multiple of 128 to keep lane-dense tiling for odd shapes.
    xr = x.reshape(N, C, HW)
    spec = pl.BlockSpec((1, C, HW), lambda n: (n, 0, 0))
    out = pl.pallas_call(
        kernel,
        out_shape=jax.ShapeDtypeStruct(xr.shape, x.dtype),
        grid_spec=pltpu.PrefetchScalarGridSpec(
            num_scalar_prefetch=0,
            grid=(N,),
            in_specs=[spec],
            out_specs=spec,
        ),
        compiler_params=pltpu.CompilerParams(
            dimension_semantics=("parallel",),
        ),
    )(xr)
    return out.reshape(N, C, H, W)


def pixelwise_norm_ref(x, alpha=1e-8):
    y = jnp.sqrt(jnp.mean(x.astype(jnp.float32) ** 2, axis=1, keepdims=True) + alpha)
    return (x / y).astype(x.dtype)


if __name__ == "__main__":
    key = jax.random.PRNGKey(0)
    x = jax.random.normal(key, (2, 4, 16, 16), dtype=jnp.float32)

    out = pixelwise_norm(x)
    out = jax.block_until_ready(out)

    ref = pixelwise_norm_ref(x)
    assert out.shape == x.shape and out.dtype == x.dtype
    assert jnp.allclose(out, ref, atol=1e-5, rtol=1e-5)

    print("KERNEL_OK")
</pallas_src>

<mosaic_0001>
module attributes {stable_mosaic.version = 11 : i64} {
  func.func @_pixelwise_norm_kernel(%arg0: i32, %arg1: i32, %arg2: memref<1x4x2x128xf32, #tpu.memory_space<vmem>>, %arg3: memref<1x4x2x128xf32, #tpu.memory_space<vmem>>) attributes {dimension_semantics = [#tpu.dimension_semantics<parallel>, #tpu.dimension_semantics<parallel>], iteration_bounds = array<i64: 2, 1>, scalar_prefetch = 0 : i64, scratch_operands = 0 : i64, tpu.core_type = #tpu.core_type<tc>, window_params = [{transform_indices = @transform_0, window_bounds = array<i64: 1, 4, 2, 128>}, {transform_indices = @transform_1, window_bounds = array<i64: 1, 4, 2, 128>}]} {
    %c0 = arith.constant 0 : index
    %c0_0 = arith.constant 0 : index
    %c0_1 = arith.constant 0 : index
    %c0_2 = arith.constant 0 : index
    %0 = vector.load %arg2[%c0, %c0_0, %c0_1, %c0_2] : memref<1x4x2x128xf32, #tpu.memory_space<vmem>>, vector<1x4x2x128xf32>
    %1 = arith.mulf %0, %0 : vector<1x4x2x128xf32>
    %cst = arith.constant dense<0.000000e+00> : vector<1x2x128xf32>
    %2 = vector.multi_reduction <add>, %1, %cst [1] : vector<1x4x2x128xf32> to vector<1x2x128xf32>
    %3 = vector.shape_cast %2 : vector<1x2x128xf32> to vector<1x1x2x128xf32>
    %cst_3 = arith.constant 2.500000e-01 : f32
    %4 = vector.broadcast %cst_3 : f32 to vector<1x1x2x128xf32>
    %5 = arith.mulf %3, %4 : vector<1x1x2x128xf32>
    %cst_4 = arith.constant 9.99999993E-9 : f32
    %6 = vector.broadcast %cst_4 : f32 to vector<1x1x2x128xf32>
    %7 = arith.addf %5, %6 : vector<1x1x2x128xf32>
    %8 = math.rsqrt %7 : vector<1x1x2x128xf32>
    %9 = vector.broadcast %8 : vector<1x1x2x128xf32> to vector<1x4x2x128xf32>
    %10 = arith.mulf %0, %9 : vector<1x4x2x128xf32>
    %c0_5 = arith.constant 0 : index
    %c0_6 = arith.constant 0 : index
    %c0_7 = arith.constant 0 : index
    %c0_8 = arith.constant 0 : index
    %11 = vector.load %arg3[%c0_5, %c0_6, %c0_7, %c0_8] : memref<1x4x2x128xf32, #tpu.memory_space<vmem>>, vector<1x4x2x128xf32>
    tpu.vector_store %arg3[%c0_5, %c0_6, %c0_7, %c0_8], %10 {strides = array<i32>} : memref<1x4x2x128xf32, #tpu.memory_space<vmem>>, vector<1x4x2x128xf32>,
    return
  }
  func.func @transform_0(%arg0: i32, %arg1: i32) -> (i32, i32, i32, i32) {
    %c0_i32 = arith.constant 0 : i32
    %c0_i32_0 = arith.constant 0 : i32
    %c0_i32_1 = arith.constant 0 : i32
    return %arg0, %c0_i32, %arg1, %c0_i32_0 : i32, i32, i32, i32
  }
  func.func @transform_1(%arg0: i32, %arg1: i32) -> (i32, i32, i32, i32) {
    %c0_i32 = arith.constant 0 : i32
    %c0_i32_0 = arith.constant 0 : i32
    %c0_i32_1 = arith.constant 0 : i32
    return %arg0, %c0_i32, %arg1, %c0_i32_0 : i32, i32, i32, i32
  }
}

</mosaic_0001>

<bundles_post_ra>
// kernel: tpu_custom_call.1
= control target key start
LH: loop header
LB: loop body
LE: loop exit
PB: predicated region body
PF: predicated region fallthrough
CT: control target
= control target key end

     0   :  { %6 = vsyncpa [#allocation3], 0  ;;  %s669_s0 = inlined_call_operand.hbm [shape: f32[2,4,2,128], index: 0, kind: input, shape index: {}]   ;;  %s670_s1 = inlined_call_operand.hbm [shape: f32[2,4,2,128], index: 1, kind: output, shape index: {}]  }
   0x1   :  { %8 = vsyncpa [#allocation3 + $0x1], 0 }
   0x2   :  { %9 = vsyncpa [#allocation4], 0 }
   0x3   :  { %11 = vsyncpa [#allocation4 + $0x1], 0  ;;  %s494_s6 = smov 0   ;;  %s496_s7 = smov 0  }
   0x4   :  { %s498_s8 = smov 0   ;;  %s500_s9 = smov 0  }
   0x5   :  { %s502_s10 = smov 0   ;;  %s504_s11 = smov 0  }
   0x6 LB: > { %s279_s12 = sadd.s32 4294967295, %s476_s11   ;;  %s280_s13 = sadd.s32 4294967294, %s476_s11   ;;  %s476_s11 = sphi %s504_s11, %s17_s11   ;;  %s472_s10 = sphi %s502_s10, %s685_s10   ;;  %s468_s9 = sphi %s500_s9, %s684_s9   ;;  %s464_s8 = sphi %s498_s8, %s683_s8   ;;  %s460_s7 = sphi %s496_s7, %s682_s7   ;;  %s456_s6 = sphi %s494_s6, %s681_s6  }
   0x7   : > { %s29_s14 = sadd.s32 1, %s472_s10  ;;  %s38_s15 = sadd.s32 1, %s464_s8 }
   0x8   : > { %p31_p0 = scmp.ge.s32.totalorder %s29_s14, 2  ;;  %p45_p1 = scmp.ne.s32.totalorder %s464_s8, %s460_s7 }
   0x9   : > { %p46_p2 = scmp.eq.s32.totalorder %s476_s11, 0  ;;  %p51_p3 = scmp.ne.s32.totalorder %s460_s7, %s456_s6 }
   0xa   : > { %s687_s14 = smov (%p31_p0, %s29_s14), 0  ;;  %p52_p5 = scmp.eq.s32.totalorder %s279_s12, 0 }
   0xb   : > { %p535_p4 = por %p46_p2, %p45_p1  ;;  %s33_s17 = ssub.s32 %s472_s10, %s687_s14 }
   0xc   : > { %p77_p6 = scmp.eq.s32.totalorder %s279_s12, 1  ;;  %p36_p7 = scmp.eq.s32.totalorder %s33_s17, 0 }
   0xd   : > { %p541_p8 = por %p52_p5, %p51_p3  ;;  %p83_p10 = scmp.eq.s32.totalorder %s280_s13, 1 }
   0xe   : > { %p545_p9 = por %p77_p6, %p45_p1  ;;  %p308_p13 = scmp.lt.s32.totalorder %s476_s11, 2 }
   0xf   : > { %s550_s20 = scalar_select %p36_p7, %s464_s8, %s38_s15  }
  0x10   : > { %s674_s19 = scalar_select %p545_p9, 1, 0 }
  0x11   : > { %p552_p11 = por %p83_p10, %p51_p3  ;;  %s103_s22 = sand.u32 1, %s464_s8  }
  0x12   : > { %s283_s23 = sshll.u32 %s103_s22, 3  ;;  %s294_s24 = sshll.u32 %s472_s10, 7 }
  0x13   : > { %s675_s21 = scalar_select %p552_p11, 1, 0 }
  0x14   : > { %s563_s27 = scalar_lea.hbm %s669_s0, %s294_s24  ;;  %s107_s28 = scalar_lea.vmem [#allocation2], %s283_s23 }
  0x15   : > { %s115_s29 = sshll.u32 %s107_s28, 4  ;;  %p569_p0 = pnand %p308_p13, %p535_p4  ;;  %s565_s29 = int_to_ptr.vmem [resolvable:$true] %s115_s29 }
  0x16   : > { %s574_s2 = scalar_lea.sflag [#allocation3], %s103_s22  ;;  %s364_s3 = scalar_lea.hbm %s563_s27, 128 }
  0x17   : > { %p365_p2 = scmp.ne.s32.totalorder %s563_s27, %s364_s3  ;;  %p366_p3 = pneg %p569_p0 }
  0x18   : > { %s369_s12 = scalar_lea.hbm %s669_s0, 256  ;;  %p370_p4 = scmp.lt.u32.totalorder %s563_s27, %s669_s0 }
  0x19   : > { %p367_p5 = pnand %p366_p3, %p365_p2  ;;  %p371_p7 = scmp.lt.u32.totalorder %s369_s12, %s364_s3 }
  0x1a   : > { %p373_p13 = scmp.lt.u32.totalorder %s364_s3, %s563_s27 }
  0x1b   : > { %p368_p6 = pneg %p367_p5  ;;  %p372_p10 = por %p371_p7, %p370_p4 }
  0x1d   : > { %p374_p12 = por %p373_p13, %p372_p10 }
  0x1f   : > { %p375_p1 = pnand %p374_p12, %p368_p6 }
  0x21   : > { %378 = shalt.err (!%p375_p1)
}
  0x22   : > { %s379_s16 = scalar_lea.vmem %s565_s29, 128  ;;  %s478_s17 = smov [#allocation2]  }
  0x23   : > { %p380_p2 = scmp.ne.s32.totalorder %s565_s29, %s379_s16  ;;  %s384_s22 = sshll.u32 %s478_s17, 4  ;;  %s385_s22 = int_to_ptr.vmem [resolvable:$false] %s384_s22 }
  0x24   : > { %s386_s23 = scalar_lea.vmem %s385_s22, 256  ;;  %p387_p9 = scmp.lt.s32.totalorder %s565_s29, %s385_s22 }
  0x25   : > { %p382_p5 = pnand %p380_p2, %p366_p3  ;;  %p388_p4 = scmp.lt.s32.totalorder %s386_s23, %s379_s16 }
  0x27   : > { %p383_p11 = pneg %p382_p5  ;;  %p389_p7 = por %p388_p4, %p387_p9 }
  0x29   : > { %p390_p10 = pnand %p389_p7, %p383_p11 }
  0x2b   : > { %393 = shalt.err (!%p390_p10)
}
  0x2c   : > { %s479_s24 = smov 32   ;;  %s480_s25 = smov 2  }
  0x2d   : > { %303 = dma.hbm_to_vmem [thread:$0]  (!%p569_p0), %s563_s27, 128, %s565_s29, %s574_s2, %s479_s24, %s479_s24, %s480_s25  }
  0x2e   : > { %p123_p12 = scmp.lt.s32.totalorder %s476_s11, 3  ;;  %p677_p1 = scmp.ge.s32.totalorder %s476_s11, 1 }
  0x30   : > { %p124_p3 = pnand %p677_p1, %p123_p12 }
  0x31   : > { %s606_s26 = sand.u32 (!%p124_p3), 1, %s460_s7  }
  0x32   : > { %127 = sbr.rel (%p124_p3) target bundleno = 101 (0x65), region = 24  ;;  %s287_s28 = sshll.u32 (!%p124_p3), %s606_s26, 3 }
  0x33   : > { %s130_s3 = scalar_lea.sflag (!%p124_p3), [#allocation3], %s606_s26  ;;  %s133_s4 = scalar_lea.vmem (!%p124_p3), [#allocation2], %s287_s28 }
  0x39   : > { %447 = dma.done.wait (%p541_p8), %s130_s3, 128  }
  0x3a   : > { %449 = vsyncadd (%p541_p8), %s130_s3, 4294967168  ;;  %vm160_vm0 = vcmask 1041408   ;;  %v152_v0 = vld [vmem:[%s133_s4] sm:$0x3]  ;;  %v153_v1 = vld [vmem:[%s133_s4 + $0x2] sm:$0x3] }
  0x3b   : > { %v154_v2 = vld [vmem:[%s133_s4 + $0x4] sm:$0x3]  ;;  %v155_v3 = vld [vmem:[%s133_s4 + $0x6] sm:$0x3]  ;;  %v156_v4 = vmul.f32 %v152_v0, %v152_v0  ;;  %v157_v5 = vmul.f32 %v153_v1, %v153_v1  ;;  %s151_s18 = scalar_lea.vmem [#allocation5], %s287_s28  ;;  %s295_s29 = sshll.u32 %s468_s9, 7 }
  0x3c   : > { %v158_v6 = vmul.f32 %v154_v2, %v154_v2  ;;  %v159_v7 = vmul.f32 %v155_v3, %v155_v3  ;;  %s194_s27 = sshll.u32 %s151_s18, 4  ;;  %s620_s5 = scalar_lea.hbm %s670_s1, %s295_s29  ;;  %s615_s27 = int_to_ptr.vmem [resolvable:$true] %s194_s27 }
  0x3d   : > { %v161_v8 = vsel %vm160_vm0, %v156_v4, 0.0  ;;  %v162_v9 = vsel %vm160_vm0, %v157_v5, 0.0  ;;  %s180_s9 = scalar_lea.sflag [#allocation4], %s606_s26  ;;  %s394_s12 = scalar_lea.vmem %s615_s27, 128 }
  0x3e   : > { %v164_v10 = vsel %vm160_vm0, %v158_v6, 0.0  ;;  %v163_v11 = vadd.f32 %v162_v9, %v161_v8  ;;  %v166_v12 = vsel %vm160_vm0, %v159_v7, 0.0  ;;  %p395_p8 = scmp.ne.s32.totalorder %s615_s27, %s394_s12  ;;  %p678_p9 = scmp.ne.s32.totalorder %s674_s19, 0 }
  0x3f   : > { %s481_s13 = smov [#allocation5]  }
  0x40   : > { %v165_v13 = vadd.f32 %v164_v10, %v163_v11  ;;  %p396_p11 = pnand %p395_p8, %p678_p9  ;;  %s398_s15 = sshll.u32 %s481_s13, 4  ;;  %s399_s15 = int_to_ptr.vmem [resolvable:$false] %s398_s15 }
  0x41   : > { %s400_s16 = scalar_lea.vmem %s399_s15, 256  ;;  %p401_p6 = scmp.lt.s32.totalorder %s615_s27, %s399_s15 }
  0x42   : > { %v167_v14 = vadd.f32 %v166_v12, %v165_v13  ;;  %p397_p0 = pneg %p396_p11  ;;  %p402_p13 = scmp.lt.s32.totalorder %s400_s16, %s394_s12 }
  0x44   : > { %v168_v15 = vmul.f32 0.25, %v167_v14  ;;  %p403_p2 = por %p402_p13, %p401_p6 }
  0x46   : > { %v169_v16 = vadd.f32 1e-08, %v168_v15  ;;  %p404_p5 = pnand %p403_p2, %p397_p0 }
  0x48   : > { %362 = vrsqrt.f32 %v169_v16 }
  0x52   : > { %v363_v17 = vpop.eup %362 }
  0x53   : > { %v171_v18 = vmul.f32 %v363_v17, %v152_v0  ;;  %v172_v19 = vmul.f32 %v363_v17, %v153_v1  ;;  %v173_v20 = vmul.f32 %v363_v17, %v154_v2  ;;  %v174_v21 = vmul.f32 %v363_v17, %v155_v3 }
  0x55   : > { %175 = vst [vmem:[%s151_s18] sm:$0x3] %v171_v18  ;;  %176 = vst [vmem:[%s151_s18 + $0x2] sm:$0x3] %v172_v19 }
  0x56   : > { %177 = vst [vmem:[%s151_s18 + $0x4] sm:$0x3] %v173_v20  ;;  %178 = vst [vmem:[%s151_s18 + $0x6] sm:$0x3] %v174_v21 }
  0x57   : > { %407 = shalt.err (!%p404_p5)
}
  0x58   : > { %s408_s17 = scalar_lea.hbm %s620_s5, 128  ;;  %s412_s24 = scalar_lea.hbm %s670_s1, 256 }
  0x59   : > { %p409_p4 = scmp.ne.s32.totalorder %s620_s5, %s408_s17  ;;  %p413_p12 = scmp.lt.u32.totalorder %s620_s5, %s670_s1 }
  0x5a   : > { %p414_p1 = scmp.lt.u32.totalorder %s412_s24, %s408_s17  ;;  %p416_p8 = scmp.lt.u32.totalorder %s408_s17, %s620_s5 }
  0x5b   : > { %p410_p7 = pnand %p409_p4, %p678_p9 }
  0x5c   : > { %p415_p3 = por %p414_p1, %p413_p12 }
  0x5d   : > { %p411_p10 = pneg %p410_p7 }
  0x5e   : > { %p417_p11 = por %p416_p8, %p415_p3 }
  0x60   : > { %p418_p0 = pnand %p417_p11, %p411_p10 }
  0x62   : > { %421 = shalt.err (!%p418_p0)
}
  0x63   : > { %s482_s3 = smov 32   ;;  %s483_s4 = smov 2  }
  0x64   : > { %298 = dma.vmem_to_hbm [thread:$0]  (%p678_p9), %s615_s27, 128, %s620_s5, %s180_s9, %s482_s3, %s482_s3, %s483_s4  }
  0x65 PF: > { %s209_s18 = sand.u32 1, %s456_s6   ;;  %p679_p6 = scmp.ne.s32.totalorder %s675_s21, 0 }
  0x66   : > { %p680_p13 = scmp.ge.s32.totalorder %s476_s11, 2  ;;  %s210_s29 = scalar_lea.sflag [#allocation4], %s209_s18 }
  0x68   : > { %p305_p2 = pnand %p680_p13, %p679_p6 }
  0x6a   : > { %451 = dma.done.wait (!%p305_p2), %s210_s29, 128  }
  0x6b   : > { %453 = vsyncadd (!%p305_p2), %s210_s29, 4294967168  ;;  %s17_s11 = sadd.s32 1, %s476_s11   ;;  %s681_s6 = smov %s460_s7 }
  0x6c   : > { %p14_p5 = scmp.ge.s32.totalorder %s17_s11, 4   ;;  %s682_s7 = smov %s464_s8 }
  0x6d   : > { %s683_s8 = smov %s550_s20  ;;  %s684_s9 = smov %s472_s10 }
  0x6e   : > { %s685_s10 = smov %s687_s14  ;;  %16 = sbr.rel (!%p14_p5) target bundleno = 6 (0x6), region = 69 }
  0x75   :  { %215 = vsyncpa [#allocation3], 1 }
  0x76   :  { %217 = vsyncpa [#allocation3 + $0x1], 1 }
  0x77   :  { %218 = vsyncpa [#allocation4], 1 }
  0x78   :  { %220 = vsyncpa [#allocation4 + $0x1], 1 }

</bundles_post_ra>
